<compile_context>
chip_gen: v7x
topology: tpu7x:2x2x1
jax: 0.10.0
libtpu: 0.0.40
codegen_flags: <defaults>
</compile_context>

<pallas_src>
import functools
import math

import jax
import jax.numpy as jnp
from jax import lax
from jax.experimental import pallas as pl
from jax.experimental.pallas import tpu as pltpu


# ---------------------------------------------------------------------------
# Capability probe: can Mosaic lower a batched dot_general whose lhs batch
# dim is not the leading dim?  If yes, we skip the explicit x relayout the
# perf review flagged; if not, we fall back to the (doc-blessed) leading-batch
# form with an in-VMEM swapaxes.  Probed once, eagerly, result cached.
# ---------------------------------------------------------------------------
@functools.lru_cache(None)
def _supports_nonleading_batch_dot():
    def probe(x_ref, w_ref, o_ref):
        o_ref[...] = lax.dot_general(
            x_ref[...], w_ref[...],
            dimension_numbers=(((2,), (2,)), ((1,), (0,))),
            preferred_element_type=jnp.float32)

    try:
        out = pl.pallas_call(
            probe,
            out_shape=jax.ShapeDtypeStruct((8, 8, 128), jnp.float32),
        )(jnp.ones((8, 8, 128), jnp.float32), jnp.ones((8, 128, 128), jnp.float32))
        jax.block_until_ready(out)
        return bool(jnp.allclose(out, 128.0))
    except Exception:  # LoweringException / NotImplementedError -> fallback
        return False


@functools.lru_cache(None)
def _vmem_params():
    """(vmem_limit_bytes, per-step block budget), generation aware."""
    cap = None
    try:
        info = pltpu.get_tpu_info()
        cap = int(getattr(info, "vmem_capacity_bytes", 0)) or None
    except Exception:
        cap = None
    if cap is None:
        cap = 64 * 1024 * 1024            # conservative: assume v7x-sized VMEM
    if cap >= 100 * 1024 * 1024:          # v5e / v6e: 128 MiB physical VMEM
        vmem_limit = 64 * 1024 * 1024
    else:                                 # v7x: 64 MiB per TensorCore
        vmem_limit = 32 * 1024 * 1024
    budget = (vmem_limit * 3) // 4        # headroom for compiler scratch
    return vmem_limit, budget


def _make_kernel(cb, O, has_bias, flatten_out, k_tiled, direct_batch):
    """Kernel over one (bb, cb[, ik]) tile.

    x block: (bb, cb, ik), w block: (cb, O, ik), bias block: (cb, 1, O).
    """

    def compute_tile(x, w):
        # -> (cb, bb, O) accumulated in f32 on the MXU.
        if direct_batch:
            # Batch dim taken in place (x axis 1, w axis 0): no x relayout.
            return lax.dot_general(
                x, w, dimension_numbers=(((2,), (2,)), ((1,), (0,))),
                preferred_element_type=jnp.float32)
        xt = jnp.swapaxes(x, 0, 1)                          # (cb, bb, ik)
        return lax.dot_general(
            xt, w, dimension_numbers=(((2,), (2,)), ((0,), (0,))),
            preferred_element_type=jnp.float32)

    def store(acc, b_ref, o_ref):
        if has_bias:
            acc = acc + b_ref[...].astype(jnp.float32)      # (cb,1,O) broadcast
        # Downcast BEFORE the relayouts (transpose + lane merge): halves the
        # bytes moved / vreg footprint for sub-f32 outputs.
        y = jnp.swapaxes(acc.astype(o_ref.dtype), 0, 1)     # (bb, cb, O)
        if flatten_out:
            # Lane-dense store: one (bb, cb*O) slab instead of cb masked
            # O-wide (O < 128) partial stores.
            o_ref[...] = y.reshape(y.shape[0], cb * O)
        else:
            o_ref[...] = y

    if not k_tiled:
        def kernel(x_ref, w_ref, *rest):
            if has_bias:
                b_ref, o_ref = rest
            else:
                b_ref = None
                (o_ref,) = rest
            store(compute_tile(x_ref[...], w_ref[...]), b_ref, o_ref)
        return kernel

    def kernel(x_ref, w_ref, *rest):
        if has_bias:
            b_ref, o_ref, acc_ref = rest
        else:
            b_ref = None
            o_ref, acc_ref = rest
        k = pl.program_id(2)

        @pl.when(k == 0)
        def _():
            acc_ref[...] = jnp.zeros_like(acc_ref)

        acc_ref[...] += compute_tile(x_ref[...], w_ref[...])

        @pl.when(k == pl.num_programs(2) - 1)
        def _():
            store(acc_ref[...], b_ref, o_ref)

    return kernel


def _choose_tiles(B, C, I, O, itemsize, has_bias, budget):
    """Pick (bb, cb, ik): batch / channel block sizes and I (reduction) tile.

    Legality ((8,128) tiling on trailing block dims):
      * cb divides C; cb == C, or (cb % 8 == 0 and (cb*O) % 128 == 0).
      * bb divides B; bb == B, or bb % 8 == 0.
      * ik divides I; ik == I, or ik % 128 == 0.
    The per-step estimate is VMEM-padding aware and includes the f32
    accumulator + transposed copy temporaries and double-buffering.
    """
    flatten = (O % 128) != 0
    sub = 8 * max(1, 4 // max(1, itemsize))      # sublane tile for this dtype

    def rup(x, m):
        return -(-x // m) * m

    def step_bytes(bb_, cb_, ik_):
        x_b = bb_ * rup(cb_, sub) * rup(ik_, 128) * itemsize
        w_b = cb_ * rup(O, sub) * rup(ik_, 128) * itemsize
        bi_b = cb_ * sub * rup(O, 128) * itemsize if has_bias else 0
        if flatten:
            o_b = rup(bb_, sub) * rup(cb_ * O, 128) * itemsize
        else:
            o_b = bb_ * rup(cb_, sub) * rup(O, 128) * itemsize
        acc_b = cb_ * rup(bb_, 8) * rup(O, 128) * 4   # f32 accumulator
        tmp_b = o_b                                   # transposed copy pre-store
        # In/out blocks are double-buffered by the pipeline.
        return 2 * (x_b + w_b + bi_b + o_b) + acc_b + tmp_b

    c_opts = [C] + [d for d in range(C - 1, 0, -1)
                    if C % d == 0 and d % 8 == 0 and (d * O) % 128 == 0]
    b_all = [B] + [d for d in range(B - 1, 0, -1) if B % d == 0 and d % 8 == 0]
    b_pref = [d for d in b_all if d <= 512] or [b_all[-1]]

    # Small I: a cb < C block makes the x DMA short/strided, so shrink the
    # batch tile before the channel group in that regime.
    if I * itemsize < 512:
        order = [(bb_, cb_) for cb_ in c_opts for bb_ in b_pref]
    else:
        order = [(bb_, cb_) for bb_ in b_pref for cb_ in c_opts]
    for bb_, cb_ in order:
        if step_bytes(bb_, cb_, I) <= budget:
            return bb_, cb_, I

    # Weight block too big even for the smallest channel group: tile the
    # contraction axis and accumulate in an f32 VMEM scratch.
    k_opts = [d for d in range(I, 0, -1) if I % d == 0 and d % 128 == 0] or [I]
    for cb_ in reversed(c_opts):          # smallest channel group first
        for ik_ in k_opts:                # then largest K tile
            for bb_ in b_pref:            # then largest batch tile
                if step_bytes(bb_, cb_, ik_) <= budget:
                    return bb_, cb_, ik_
    return b_all[-1], c_opts[-1], k_opts[-1]


def _batched_linear_pallas(x, weight, bias, force_tiles=None):
    B, C, I = x.shape
    _, O, _ = weight.shape
    if weight.dtype != x.dtype:
        weight = weight.astype(x.dtype)
    has_bias = bias is not None

    vmem_limit, budget = _vmem_params()
    if force_tiles is not None:
        bb, cb, ik = force_tiles
    else:
        bb, cb, ik = _choose_tiles(B, C, I, O, x.dtype.itemsize, has_bias, budget)

    k_tiled = ik != I
    flatten_out = (O % 128) != 0
    direct_batch = _supports_nonleading_batch_dot()
    nc, nb, nk = C // cb, B // bb, I // ik

    if flatten_out:
        out_shape = jax.ShapeDtypeStruct((B, C * O), x.dtype)
    else:
        out_shape = jax.ShapeDtypeStruct((B, C, O), x.dtype)

    # Megacore: split on the channel axis whenever possible so each core keeps
    # its own weight block resident across batch tiles (halves weight HBM
    # traffic on v7x); fall back to splitting on batch only when C//cb == 1.
    if not k_tiled:
        grid = (nc, nb)
        x_spec = pl.BlockSpec((bb, cb, I), lambda c, b: (b, c, 0))
        w_spec = pl.BlockSpec((cb, O, I), lambda c, b: (c, 0, 0))
        b_spec = pl.BlockSpec((cb, 1, O), lambda c, b: (c, 0, 0))
        if flatten_out:
            out_spec = pl.BlockSpec((bb, cb * O), lambda c, b: (b, c))
        else:
            out_spec = pl.BlockSpec((bb, cb, O), lambda c, b: (b, c, 0))
        scratch_shapes = []
        dims = ("parallel", "arbitrary") if nc >= 2 else ("arbitrary", "parallel")
    else:
        grid = (nc, nb, nk)   # reduction axis innermost
        x_spec = pl.BlockSpec((bb, cb, ik), lambda c, b, k: (b, c, k))
        w_spec = pl.BlockSpec((cb, O, ik), lambda c, b, k: (c, 0, k))
        b_spec = pl.BlockSpec((cb, 1, O), lambda c, b, k: (c, 0, 0))
        if flatten_out:
            out_spec = pl.BlockSpec((bb, cb * O), lambda c, b, k: (b, c))
        else:
            out_spec = pl.BlockSpec((bb, cb, O), lambda c, b, k: (b, c, 0))
        scratch_shapes = [pltpu.VMEM((cb, bb, O), jnp.float32)]
        dims = (("parallel", "arbitrary", "arbitrary") if nc >= 2
                else ("arbitrary", "parallel", "arbitrary"))

    in_specs = [x_spec, w_spec]
    args = [x, weight]
    if has_bias:
        in_specs.append(b_spec)
        args.append(bias.astype(x.dtype).reshape(C, 1, O))

    itemsize = x.dtype.itemsize
    bytes_accessed = (B * C * I + C * O * I + B * C * O
                      + (C * O if has_bias else 0)) * itemsize
    cost = pl.CostEstimate(flops=2 * B * C * I * O, transcendentals=0,
                           bytes_accessed=bytes_accessed)

    out = pl.pallas_call(
        _make_kernel(cb, O, has_bias, flatten_out, k_tiled, direct_batch),
        out_shape=out_shape,
        grid=grid,
        in_specs=in_specs,
        out_specs=out_spec,
        scratch_shapes=scratch_shapes,
        compiler_params=pltpu.CompilerParams(
            dimension_semantics=dims,
            vmem_limit_bytes=vmem_limit),
        cost_estimate=cost,
    )(*args)

    if flatten_out:
        out = out.reshape(B, C, O)   # free: only splits the trailing dim
    return out


def batched_linear(x, weight, bias=None, *, use_pallas=None, force_tiles=None):
    """x: (B, C, I), weight: (C, O, I), bias: (C, O) or None -> (B, C, O)."""
    B, C, I = x.shape
    Cw, O, Iw = weight.shape
    assert C == Cw and I == Iw
    if use_pallas is None:
        flops = 2 * B * C * I * O
        # Per-channel (bb,I)x(I,O) matmuls use only ~(I/256)*(min(O,256)/256)
        # of a v6e/v7x MXU; for small I/O stay on the XLA einsum path unless
        # there is substantially more work to amortize the launch.
        min_flops = (1 << 22) if min(I, O) >= 128 else (1 << 25)
        use_pallas = flops >= min_flops
    if not use_pallas:
        out = jnp.einsum("bci,coi->bco", x, weight,
                         preferred_element_type=jnp.float32)
        if bias is not None:
            out = out + bias[None].astype(jnp.float32)
        return out.astype(x.dtype)
    return _batched_linear_pallas(x, weight, bias, force_tiles=force_tiles)


def init_batched_linear_params(key, n_channels, in_size, out_size,
                               bias=False, init="fan_in", dtype=jnp.float32):
    """Re-implementation of BatchedLinear.__init__ init schemes."""
    if init == "one_hot":
        w = jnp.zeros((n_channels, out_size, in_size), dtype)
        w = w.at[:, :, -1].set(1.0)
    elif init == "fan_in":
        bound = 1.0 / math.sqrt(in_size)
        w = jax.random.uniform(key, (n_channels, out_size, in_size),
                               dtype, minval=-bound, maxval=bound)
    elif init == "fan_out":
        bound = 1.0 / math.sqrt(out_size)
        w = jax.random.uniform(key, (n_channels, out_size, in_size),
                               dtype, minval=-bound, maxval=bound)
    elif init == "zero":
        w = jnp.zeros((n_channels, out_size, in_size), dtype)
    else:
        raise ValueError(f"Unknown init {init}")
    b = jnp.zeros((n_channels, out_size), dtype) if bias else None
    return w, b


if __name__ == "__main__":
    key = jax.random.PRNGKey(0)
    k_w, k_w2, k_w3, k_x, k_x2, k_x3 = jax.random.split(key, 6)

    # MXU default precision (bf16 passes, f32 accumulate) -> loose-ish tol;
    # semantic errors (wrong channel / transpose / bias) would be O(0.1-1).
    TOL = 2e-2

    # 1) Module-scale small shapes (B=8, C=4, I=16, O=32), with bias.
    #    O % 128 != 0 -> lane-dense (B, C*O) output slab path.
    B, C, I, O = 8, 4, 16, 32
    w1, b1 = init_batched_linear_params(k_w, C, I, O, bias=True, init="fan_in")
    b1 = b1 + 0.1  # non-zero so the bias path is actually verified
    x1 = jax.random.normal(k_x, (B, C, I), jnp.float32)
    out1 = jax.block_until_ready(
        jax.jit(functools.partial(batched_linear, use_pallas=True))(x1, w1, b1))
    ref1 = jnp.einsum("bci,coi->bco", x1, w1) + b1[None]
    assert out1.shape == (B, C, O)
    assert jnp.allclose(out1, ref1, atol=TOL, rtol=TOL), \
        float(jnp.max(jnp.abs(out1 - ref1)))

    # 2) O % 128 == 0 (plain 3D store path), no bias.
    B2, C2, I2, O2 = 64, 8, 128, 128
    w2, _ = init_batched_linear_params(k_w2, C2, I2, O2, bias=False, init="fan_in")
    x2 = jax.random.normal(k_x2, (B2, C2, I2), jnp.float32)
    out2 = jax.block_until_ready(
        jax.jit(functools.partial(batched_linear, use_pallas=True))(x2, w2))
    ref2 = jnp.einsum("bci,coi->bco", x2, w2)
    assert out2.shape == (B2, C2, O2)
    assert jnp.allclose(out2, ref2, atol=TOL, rtol=TOL), \
        float(jnp.max(jnp.abs(out2 - ref2)))

    # 3) Force the K-tiled (I-reduction) path on a small shape to verify the
    #    accumulator init / finalize logic (grid = (1, 1, 2)).
    B3, C3, I3, O3 = 16, 8, 256, 128
    w3, _ = init_batched_linear_params(k_w3, C3, I3, O3, bias=False, init="fan_in")
    x3 = jax.random.normal(k_x3, (B3, C3, I3), jnp.float32)
    out3 = jax.block_until_ready(
        jax.jit(functools.partial(batched_linear, use_pallas=True,
                                  force_tiles=(16, 8, 128)))(x3, w3))
    ref3 = jnp.einsum("bci,coi->bco", x3, w3)
    assert out3.shape == (B3, C3, O3)
    assert jnp.allclose(out3, ref3, atol=TOL, rtol=TOL), \
        float(jnp.max(jnp.abs(out3 - ref3)))

    # TODO(synk): precision=jax.lax.Precision.HIGHEST option for numerically
    # sensitive downstream normalizers; pl.Buffered(3) on x/out specs for
    # short-step v6e cases.
    print("KERNEL_OK")
</pallas_src>

<mosaic_0001>
module attributes {stable_mosaic.version = 11 : i64} {
  func.func @kernel(%arg0: i32, %arg1: i32, %arg2: memref<8x4x16xf32, #tpu.memory_space<vmem>>, %arg3: memref<4x32x16xf32, #tpu.memory_space<vmem>>, %arg4: memref<4x1x32xf32, #tpu.memory_space<vmem>>, %arg5: memref<8x128xf32, #tpu.memory_space<vmem>>) attributes {dimension_semantics = [#tpu.dimension_semantics<arbitrary>, #tpu.dimension_semantics<parallel>], iteration_bounds = array<i64: 1, 1>, scalar_prefetch = 0 : i64, scratch_operands = 0 : i64, tpu.core_type = #tpu.core_type<tc>, window_params = [{transform_indices = @transform_0, window_bounds = array<i64: 8, 4, 16>}, {transform_indices = @transform_1, window_bounds = array<i64: 4, 32, 16>}, {transform_indices = @transform_2, window_bounds = array<i64: 4, 1, 32>}, {transform_indices = @transform_3, window_bounds = array<i64: 8, 128>}]} {
    %c0 = arith.constant 0 : index
    %c0_0 = arith.constant 0 : index
    %c0_1 = arith.constant 0 : index
    %0 = vector.load %arg2[%c0, %c0_0, %c0_1] : memref<8x4x16xf32, #tpu.memory_space<vmem>>, vector<8x4x16xf32>
    %c0_2 = arith.constant 0 : index
    %c0_3 = arith.constant 0 : index
    %c0_4 = arith.constant 0 : index
    %1 = vector.load %arg3[%c0_2, %c0_3, %c0_4] : memref<4x32x16xf32, #tpu.memory_space<vmem>>, vector<4x32x16xf32>
    %2 = tpu.transpose %0, [1, 0, 2] : vector<8x4x16xf32> -> vector<4x8x16xf32>
    %cst = arith.constant dense<0.000000e+00> : vector<4x8x32xf32>
    %3 = tpu.matmul %2, %1, %cst {dimension_numbers = #tpu.dot_dimension_numbers<[2], [2], [1], [1], [0, 0, 0, 1, 1, 1], [0], [0]>} : vector<4x8x16xf32>, vector<4x32x16xf32>, vector<4x8x32xf32> -> vector<4x8x32xf32>
    %c0_5 = arith.constant 0 : index
    %c0_6 = arith.constant 0 : index
    %c0_7 = arith.constant 0 : index
    %4 = vector.load %arg4[%c0_5, %c0_6, %c0_7] : memref<4x1x32xf32, #tpu.memory_space<vmem>>, vector<4x1x32xf32>
    %5 = vector.broadcast %4 : vector<4x1x32xf32> to vector<4x8x32xf32>
    %6 = arith.addf %3, %5 : vector<4x8x32xf32>
    %7 = tpu.transpose %6, [1, 0, 2] : vector<4x8x32xf32> -> vector<8x4x32xf32>
    %8 = vector.shape_cast %7 : vector<8x4x32xf32> to vector<8x128xf32>
    %c0_8 = arith.constant 0 : index
    %c0_9 = arith.constant 0 : index
    %9 = vector.load %arg5[%c0_8, %c0_9] : memref<8x128xf32, #tpu.memory_space<vmem>>, vector<8x128xf32>
    tpu.vector_store %arg5[%c0_8, %c0_9], %8 {strides = array<i32>} : memref<8x128xf32, #tpu.memory_space<vmem>>, vector<8x128xf32>,
    return
  }
  func.func @transform_0(%arg0: i32, %arg1: i32) -> (i32, i32, i32) {
    %c0_i32 = arith.constant 0 : i32
    %c0_i32_0 = arith.constant 0 : i32
    return %arg1, %arg0, %c0_i32 : i32, i32, i32
  }
  func.func @transform_1(%arg0: i32, %arg1: i32) -> (i32, i32, i32) {
    %c0_i32 = arith.constant 0 : i32
    %c0_i32_0 = arith.constant 0 : i32
    %c0_i32_1 = arith.constant 0 : i32
    return %arg0, %c0_i32, %c0_i32_0 : i32, i32, i32
  }
  func.func @transform_2(%arg0: i32, %arg1: i32) -> (i32, i32, i32) {
    %c0_i32 = arith.constant 0 : i32
    %c0_i32_0 = arith.constant 0 : i32
    %c0_i32_1 = arith.constant 0 : i32
    return %arg0, %c0_i32, %c0_i32_0 : i32, i32, i32
  }
  func.func @transform_3(%arg0: i32, %arg1: i32) -> (i32, i32) {
    %c0_i32 = arith.constant 0 : i32
    return %arg1, %arg0 : i32, i32
  }
}

</mosaic_0001>

<bundles_post_ra>
// kernel: batched_linear.1
= control target key start
LH: loop header
LB: loop body
LE: loop exit
PB: predicated region body
PF: predicated region fallthrough
CT: control target
= control target key end

     0   :  { %vm134_vm0 = vcmask 130048   ;;  %v768_v0 = vmov 0.0|0.0   ;;  %v42_v4 = vlaneseq  ;;  %vm769_vm2 = vmmov 0   ;;  %s774_s4 = smov 32   ;;  %s775_s5 = smov 64   ;;  %s937_s1 = inlined_call_operand.vmem [shape: f32[4,32,16], index: 1, kind: input, shape index: {}]   ;;  %s938_s0 = inlined_call_operand.vmem [shape: f32[8,4,16], index: 0, kind: input, shape index: {}]   ;;  %s939_s2 = inlined_call_operand.vmem [shape: f32[4,1,32], index: 2, kind: input, shape index: {}]   ;;  %s940_s3 = inlined_call_operand.vmem [shape: f32[8,128], index: 3, kind: output, shape index: {}]  }
   0x1   :  { %724 = vmatprep.subr.bf16.mxu0 %v768_v0  ;;  %732 = vmatprep.subr.bf16.mxu1 %v768_v0  ;;  %v22_v1 = vld [vmem:[%s937_s1] sm:$0xff]  ;;  %v23_v2 = vld [vmem:[%s937_s1 + $0x8] sm:$0xff]  ;;  %vm806_vm1 = vmpackc.low %vm134_vm0, %vm134_vm0  ;;  %v770_v8 = vmov 0.0   ;;  %v771_v9 = vmov 1983009808   ;;  %vm623_vm3 = vcmask 261120  }
   0x2   :  { %v725_v5 = vpack.c.bf16 %v23_v2, %v22_v1  ;;  %v26_v6 = vld [vmem:[%s937_s1 + $0x20] sm:$0xff]  ;;  %v27_v7 = vld [vmem:[%s937_s1 + $0x28] sm:$0xff]  ;;  %688 = vmatprep.mubr.msk.f32.mxu0 %vm769_vm2, %v770_v8  ;;  %699 = vmatprep.mubr.msk.f32.mxu1 %vm769_vm2, %v770_v8  ;;  %v40_v10 = vunpack.c.l.s4 %v771_v9  ;;  %v772_v11 = vmov 1934713408   ;;  %v24_v14 = vld [vmem:[%s937_s1 + $0x10] sm:$0xff]  ;;  %v43_v18 = vshrl.u32 %v42_v4, 7 }
   0x3   :  { %v73_v12 = vunpack.c.l.s4 %v772_v11  ;;  %v733_v13 = vpack.c.bf16 %v27_v7, %v26_v6  ;;  %v25_v15 = vld [vmem:[%s937_s1 + $0x18] sm:$0xff]  ;;  %v28_v16 = vld [vmem:[%s937_s1 + $0x30] sm:$0xff]  ;;  %v764_v21 = vld [vmem:[%s938_s0] ss:$8 sps:$4 sm:$0xff]   ;;  %vm625_vm4 = vcmask 523264   ;;  %vm627_vm5 = vcmask 785408  }
   0x4   :  { %v29_v17 = vld [vmem:[%s937_s1 + $0x38] sm:$0xff]  ;;  %727 = vmatpush3.bf16.xpose.msk.msra.mxu0 %vm806_vm1, %v725_v5  ;;  %v41_v19 = vunpack.c.0.s8 %v40_v10  ;;  %v765_v23 = vld [vmem:[%s938_s0 + $0x4] ss:$8 sps:$4 sm:$0xff]   ;;  %v729_v26 = vpack.c.bf16 %v25_v15, %v24_v14  ;;  %v32_v45 = vld [vmem:[%s937_s1 + $0x50] sm:$0xff] }
   0x5   :  { %735 = vmatpush3.bf16.xpose.msk.msra.mxu1 %vm806_vm1, %v733_v13  ;;  %728 = vmatprep.subr.bf16.mxu0 %v768_v0  ;;  %v74_v20 = vunpack.c.0.s8 %v73_v12  ;;  %v766_v24 = vld [vmem:[%s938_s0 + $0x10] ss:$8 sps:$4 sm:$0xff]   ;;  %v767_v25 = vld [vmem:[%s938_s0 + $0x14] ss:$8 sps:$4 sm:$0xff]   ;;  %v737_v27 = vpack.c.bf16 %v29_v17, %v28_v16  ;;  %v30_v37 = vld [vmem:[%s937_s1 + $0x40] sm:$0xff] }
   0x6   :  { %736 = vmatprep.subr.bf16.mxu1 %v768_v0  ;;  %v839_v22 = vsub.s32 %v41_v19, %v43_v18  ;;  %v31_v38 = vld [vmem:[%s937_s1 + $0x48] sm:$0xff]  ;;  %v34_v39 = vld [vmem:[%s937_s1 + $0x60] sm:$0xff]  ;;  %v33_v46 = vld [vmem:[%s937_s1 + $0x58] sm:$0xff] }
   0x7   :  { %v854_v32 = vsub.s32 %v74_v20, %v43_v18  ;;  %v35_v40 = vld [vmem:[%s937_s1 + $0x68] sm:$0xff]  ;;  %v741_v43 = vpack.c.bf16 %v31_v38, %v30_v37  ;;  %v36_v47 = vld [vmem:[%s937_s1 + $0x70] sm:$0xff]  ;;  %v37_v48 = vld [vmem:[%s937_s1 + $0x78] sm:$0xff]  ;;  %v745_v51 = vpack.c.bf16 %v33_v46, %v32_v45 }
   0x8   :  { %v45_v28 = vrot.slane %v764_v21, %v839_v22  ;;  %v53_v29 = vrot.slane %v765_v23, %v839_v22  ;;  %v61_v30 = vrot.slane %v766_v24, %v839_v22  ;;  %v69_v31 = vrot.slane %v767_v25, %v839_v22  ;;  %v634_v61 = vld [vmem:[%s939_s2] ss:$0 sm:$0xff]  ;;  %v636_v62 = vld [vmem:[%s939_s2 + $0x2] ss:$0 sm:$0xff]  ;;  %v635_v63 = vld [vmem:[%s939_s2 + $0x1] ss:$0 sm:$0xff] }
   0x9   :  { %v749_v44 = vpack.c.bf16 %v35_v40, %v34_v39  ;;  %v753_v52 = vpack.c.bf16 %v37_v48, %v36_v47 }
   0xa   :  { %v70_v33 = vcombine.low %v45_v28, %v53_v29  ;;  %v86_v34 = vcombine.low %v61_v30, %v69_v31  ;;  %v71_v49 = vcombine.high %v45_v28, %v53_v29  ;;  %v87_v50 = vcombine.high %v61_v30, %v69_v31 }
   0xc   :  { %731 = vmatpush3.bf16.xpose.msk.msra.mxu0 %vm806_vm1, %v729_v26  ;;  %v78_v35 = vrot.slane %v70_v33, %v854_v32  ;;  %v94_v36 = vrot.slane %v86_v34, %v854_v32  ;;  %v85_v53 = vrot.slane %v71_v49, %v854_v32  ;;  %v101_v54 = vrot.slane %v87_v50, %v854_v32 }
   0xd   :  { %739 = vmatpush3.bf16.xpose.msk.msra.mxu1 %vm806_vm1, %v737_v27  ;;  %740 = vmatprep.subr.bf16.mxu0 %v768_v0 }
   0xe   :  { %748 = vmatprep.subr.bf16.mxu1 %v768_v0  ;;  %v102_v41 = vcombine.low %v78_v35, %v94_v36  ;;  %v103_v42 = vcombine.high %v78_v35, %v94_v36  ;;  %v104_v55 = vcombine.low %v85_v53, %v101_v54  ;;  %v105_v56 = vcombine.high %v85_v53, %v101_v54 }
  0x13   :  { %689 = vmatmul.mubr.msk.f32.vlgmr.msra.gmra.mrb[0].mxu0 %vm134_vm0, %v102_v41 }
  0x14   :  { %700 = vmatmul.mubr.msk.f32.vlgmr.msra.gmra.mrb[0].mxu1 %vm134_vm0, %v103_v42  ;;  %743 = vmatpush3.bf16.xpose.msk.msra.mxu0 %vm806_vm1, %v741_v43 }
  0x15   :  { %751 = vmatpush3.bf16.xpose.msk.msra.mxu1 %vm806_vm1, %v749_v44  ;;  %744 = vmatprep.subr.bf16.mxu0 %v768_v0 }
  0x16   :  { %752 = vmatprep.subr.bf16.mxu1 %v768_v0  ;;  %710 = vmatprep.mubr.msk.f32.mxu0 %vm769_vm2, %v770_v8  ;;  %v637_v0 = vld [vmem:[%s939_s2 + $0x3] ss:$0 sm:$0xff]  ;;  %s773_s2 = smov 96  }
  0x17   :  { %721 = vmatprep.mubr.msk.f32.mxu1 %vm769_vm2, %v770_v8 }
  0x1c   :  { %747 = vmatpush3.bf16.xpose.msk.msra.mxu0 %vm806_vm1, %v745_v51 }
  0x1d   :  { %755 = vmatpush3.bf16.xpose.msk.msra.mxu1 %vm806_vm1, %v753_v52 }
  0x23   :  { %711 = vmatmul.mubr.msk.f32.vlgmr.msra.gmra.mrb[2].mxu0 %vm134_vm0, %v104_v55 }
  0x24   :  { %722 = vmatmul.mubr.msk.f32.vlgmr.msra.gmra.mrb[2].mxu1 %vm134_vm0, %v105_v56 }
  0xe6   :  { %v216_v57 = vpop.f32.mrb[0].mxu0 }
  0xe7   :  { %v301_v58 = vpop.f32.mrb[0].mxu1  ;;  %v690_v59 = vpop.f32.mrb[1].mxu0  ;;  %v217_v2 = vadd.f32 %v634_v61, %v216_v57 }
  0xe8   :  { %v701_v60 = vpop.f32.mrb[1].mxu1  ;;  %v302_v6 = vadd.f32 %v635_v63, %v301_v58 }
  0xf6   :  { %v386_v1 = vpop.f32.mrb[2].mxu0 }
  0xf7   :  { %v387_v3 = vadd.f32 %v636_v62, %v386_v1  ;;  %v471_v4 = vpop.f32.mrb[2].mxu1  ;;  %v712_v5 = vpop.f32.mrb[3].mxu0 }
  0xf8   :  { %v472_v7 = vadd.f32 %v637_v0, %v471_v4  ;;  %v723_v8 = vpop.f32.mrb[3].mxu1 }
  0xf9   :  { %v475_v9 = vcombine.low %v217_v2, %v387_v3  ;;  %v476_v10 = vcombine.high %v217_v2, %v387_v3 }
  0xfa   :  { %v491_v11 = vcombine.low %v302_v6, %v472_v7  ;;  %v492_v12 = vcombine.high %v302_v6, %v472_v7 }
  0xfb   :  { %v483_v13 = vrot.slane %v475_v9, %v839_v22  ;;  %v490_v14 = vrot.slane %v476_v10, %v839_v22 }
  0xfc   :  { %v499_v15 = vrot.slane %v491_v11, %v839_v22  ;;  %v506_v16 = vrot.slane %v492_v12, %v839_v22 }
  0xfe   :  { %v507_v17 = vcombine.low %v483_v13, %v499_v15  ;;  %v508_v18 = vcombine.high %v483_v13, %v499_v15  ;;  %v523_v19 = vcombine.low %v490_v14, %v506_v16  ;;  %v524_v20 = vcombine.high %v490_v14, %v506_v16 }
 0x100   :  { %v515_v21 = vrot.slane %v507_v17, %v854_v32  ;;  %v522_v23 = vrot.slane %v508_v18, %v854_v32  ;;  %v531_v24 = vrot.slane %v523_v19, %v854_v32  ;;  %v538_v25 = vrot.slane %v524_v20, %v854_v32 }
 0x102   :  { %v543_v26 = vcombine.low %v515_v21, %v522_v23  ;;  %v658_v27 = vcombine.high %v515_v21, %v522_v23  ;;  %v559_v28 = vcombine.low %v531_v24, %v538_v25  ;;  %v659_v29 = vcombine.high %v531_v24, %v538_v25 }
 0x104   :  { %v550_v30 = vrot.slane %v543_v26, %v839_v22  ;;  %v558_v31 = vrot.slane %v658_v27, %v839_v22  ;;  %v566_v33 = vrot.slane %v559_v28, %v839_v22  ;;  %v574_v34 = vrot.slane %v659_v29, %v839_v22 }
 0x106   :  { %v576_v35 = vcombine.high %v550_v30, %v558_v31  ;;  %v592_v36 = vcombine.high %v566_v33, %v574_v34  ;;  %v575_v37 = vcombine.low %v550_v30, %v558_v31  ;;  %v591_v38 = vcombine.low %v566_v33, %v574_v34 }
 0x108   :  { %v590_v39 = vrot.slane %v576_v35, %v854_v32  ;;  %v606_v40 = vrot.slane %v592_v36, %v854_v32  ;;  %v583_v41 = vrot.slane %v575_v37, %v854_v32  ;;  %v599_v42 = vrot.slane %v591_v38, %v854_v32 }
 0x10a   :  { %v610_v43 = vcombine.high %v590_v39, %v606_v40  ;;  %v608_v44 = vcombine.high %v583_v41, %v599_v42  ;;  %v607_v45 = vcombine.low %v583_v41, %v599_v42  ;;  %v609_v46 = vcombine.low %v590_v39, %v606_v40 }
 0x10c   :  { %620 = vrot.lane.b32.xlu1 %v610_v43, %s773_s2  ;;  %612 = vrot.lane.b32.xlu0 %v608_v44, %s774_s4 }
 0x110   :  { %616 = vrot.lane.b32.xlu0 %v609_v46, %s775_s5 }
 0x17e   :  { %v613_v22 = vpop.permute.xlu0 %612  ;;  %v621_v49 = vpop.permute.xlu1 %620 }
 0x17f   :  { %v624_v47 = vsel %vm623_vm3, %v607_v45, %v613_v22 }
 0x182   :  { %v617_v48 = vpop.permute.xlu0 %616 }
 0x183   :  { %v626_v50 = vsel %vm625_vm4, %v624_v47, %v617_v48 }
 0x184   :  { %v628_v51 = vsel %vm627_vm5, %v626_v50, %v621_v49 }
 0x185   :  { %629 = vst [vmem:[%s940_s3] sm:$0xff] %v628_v51 }

</bundles_post_ra>
